<compile_context>
chip_gen: v6e
topology: v6e:2x2x1
jax: 0.10.0
libtpu: 0.0.40
codegen_flags: <defaults>
</compile_context>

<pallas_src>
import functools

import jax
import jax.numpy as jnp
import numpy as np
from jax.experimental import pallas as pl
from jax.experimental.pallas import tpu as pltpu


def _round_up(x, m):
    return ((x + m - 1) // m) * m


# ----------------------------------------------------------------------------
# Kernel 1: masked GRU recurrence + linear1/relu (all operands resident in VMEM)
# ----------------------------------------------------------------------------
def _gru_stage1_kernel(maxlen_ref,   # SMEM (1,)  i32  max(sample_len)
                       lens_ref,     # VMEM (Bp,1) i32 per-row valid length
                       x_ref,        # VMEM (T*Bp,E) bf16 time-major embeddings
                       wih_ref,      # VMEM (E,3H) bf16  [W_ir|W_iz|W_in]^T
                       whh_ref,      # VMEM (H,3H) bf16  [W_hr|W_hz|W_hn]^T
                       bi_ref,       # VMEM (1,3H) f32   [b_ir+b_hr|b_iz+b_hz|b_in]
                       bhn_ref,      # VMEM (1,H)  f32   b_hn (stays inside r*(.))
                       w1_ref,       # VMEM (H,H2) bf16  linear1 weight^T
                       b1_ref,       # VMEM (1,H2) f32
                       a1_ref,       # out  (Bp,H2) bf16 relu(linear1(h))
                       *gi_refs,     # VMEM f32 scratch for hoisted input proj
                       b_pad, hidden, fuse_gates):
    H = hidden
    B = b_pad
    f32 = jnp.float32

    x = x_ref[...]                                     # (T*B, E) bf16

    # ---- Hoisted input projection: off the serial critical path. ----
    if fuse_gates:
        gi_ref, = gi_refs                              # (T*B, 3H) f32
        gi_ref[...] = (jnp.dot(x, wih_ref[...], preferred_element_type=f32)
                       + bi_ref[...])
    else:
        # H < 128: per-gate dots avoid non-lane-aligned result slicing.
        gir_ref, giz_ref, gin_ref = gi_refs            # each (T*B, H) f32
        wih = wih_ref[...]
        bi = bi_ref[...]
        gir_ref[...] = jnp.dot(x, wih[:, :H], preferred_element_type=f32) + bi[:, :H]
        giz_ref[...] = jnp.dot(x, wih[:, H:2 * H], preferred_element_type=f32) + bi[:, H:2 * H]
        gin_ref[...] = jnp.dot(x, wih[:, 2 * H:], preferred_element_type=f32) + bi[:, 2 * H:]

    whh = whh_ref[...]                                 # (H, 3H) bf16
    if not fuse_gates:
        whh_r, whh_z, whh_n = whh[:, :H], whh[:, H:2 * H], whh[:, 2 * H:]
    bhn = bhn_ref[...]                                 # (1, H) f32
    lens = lens_ref[...]                               # (B, 1) i32

    def step(t, h):
        lo = pl.multiple_of(t * B, B)                  # sublane-aligned slice start
        hb = h.astype(jnp.bfloat16)
        if fuse_gates:
            gi_t = gi_refs[0][pl.ds(lo, B), :]         # (B, 3H) f32
            gh = jnp.dot(hb, whh, preferred_element_type=f32)   # one MXU push/step
            gi_r, gi_z, gi_n = gi_t[:, :H], gi_t[:, H:2 * H], gi_t[:, 2 * H:]
            gh_r, gh_z, gh_n = gh[:, :H], gh[:, H:2 * H], gh[:, 2 * H:]
        else:
            gi_r = gi_refs[0][pl.ds(lo, B), :]
            gi_z = gi_refs[1][pl.ds(lo, B), :]
            gi_n = gi_refs[2][pl.ds(lo, B), :]
            gh_r = jnp.dot(hb, whh_r, preferred_element_type=f32)
            gh_z = jnp.dot(hb, whh_z, preferred_element_type=f32)
            gh_n = jnp.dot(hb, whh_n, preferred_element_type=f32)
        r = jax.nn.sigmoid(gi_r + gh_r)
        z = jax.nn.sigmoid(gi_z + gh_z)
        n = jnp.tanh(gi_n + r * (gh_n + bhn))
        h_new = (1.0 - z) * n + z * h
        # packed-sequence semantics: freeze rows with t >= sample_len (NaN-safe)
        return jnp.where(lens > t, h_new, h)

    h0 = jnp.zeros((B, H), f32)
    h = jax.lax.fori_loop(0, maxlen_ref[0], step, h0)
    # TODO(synk): add unroll=2..4 once dynamic-bound fori_loop unrolling lands.

    a1 = jnp.maximum(
        jnp.dot(h.astype(jnp.bfloat16), w1_ref[...],
                preferred_element_type=f32) + b1_ref[...], 0.0)
    a1_ref[...] = a1.astype(a1_ref.dtype)


# ----------------------------------------------------------------------------
# Kernel 2: linear2 head, tiled over the item dimension (parallel grid axis)
# ----------------------------------------------------------------------------
def _head_kernel(a1_ref,    # (Bp, H2)     bf16  (block index constant -> resident)
                 w2_ref,    # (H2, TILE_N) bf16  streamed per grid step
                 b2_ref,    # (1, TILE_N)  f32
                 out_ref):  # (Bp, TILE_N) f32
    out_ref[...] = (jnp.dot(a1_ref[...], w2_ref[...],
                            preferred_element_type=jnp.float32) + b2_ref[...])


def _pick_tile_n(i_pad, cap=2048):
    # Largest multiple of 128 that divides I_pad and is <= cap.
    t = min(i_pad, cap)
    while i_pad % t != 0:
        t -= 128
    return t


# ----------------------------------------------------------------------------
# One-time parameter preparation (split / transpose / cast / pad weights).
# ----------------------------------------------------------------------------
def prepare_params(params):
    H = params["W_hh"].shape[1]
    E = params["W_ih"].shape[1]
    I = params["b2"].shape[0]
    I_pad = _round_up(I, 128)                          # lane-dense head output

    Wih, Whh = params["W_ih"], params["W_hh"]          # (3H, E), (3H, H)
    bih, bhh = params["b_ih"], params["b_hh"]

    wih = Wih.T.astype(jnp.bfloat16)                   # (E, 3H)
    whh = Whh.T.astype(jnp.bfloat16)                   # (H, 3H)
    bi = jnp.concatenate([bih[:H] + bhh[:H],           # r/z biases fold
                          bih[H:2 * H] + bhh[H:2 * H],
                          bih[2 * H:]]).reshape(1, 3 * H).astype(jnp.float32)
    bhn = bhh[2 * H:].reshape(1, H).astype(jnp.float32)

    w1 = params["W1"].T.astype(jnp.bfloat16)           # (H, H//2)
    b1 = params["b1"].reshape(1, -1).astype(jnp.float32)
    w2 = jnp.zeros((H // 2, I_pad), jnp.bfloat16).at[:, :I].set(
        params["W2"].T.astype(jnp.bfloat16))
    b2 = jnp.zeros((1, I_pad), jnp.float32).at[:, :I].set(
        params["b2"].astype(jnp.float32))
    emb = params["item_embedding"].astype(jnp.bfloat16)

    return dict(emb=emb, wih=wih, whh=whh, bi=bi, bhn=bhn, w1=w1, b1=b1,
                w2=w2, b2=b2, hidden=H, embed=E, item_num=I, i_pad=I_pad)


# ----------------------------------------------------------------------------
# Forward wrapper (embedding gather + padding is glue; two pallas_calls).
# ----------------------------------------------------------------------------
def vanilla_gru_forward(prep, user, item, behavior, sample_len):
    del user, behavior                                  # unused in reference fwd
    B, T = item.shape
    H = prep["hidden"]
    H2 = H // 2
    I, I_pad = prep["item_num"], prep["i_pad"]
    B_pad = _round_up(B, 16)                            # bf16 sublane pack

    # Embedding gather, time-major, batch-padded, flattened to 2-D (bf16).
    x = prep["emb"][item]                               # (B, T, E) bf16
    x = jnp.transpose(x, (1, 0, 2))                     # (T, B, E)
    x = jnp.pad(x, ((0, 0), (0, B_pad - B), (0, 0)))    # (T, Bp, E)
    x2d = x.reshape(T * B_pad, -1)

    lens = jnp.pad(sample_len.astype(jnp.int32),
                   (0, B_pad - B)).reshape(B_pad, 1)    # pad rows: length 0
    max_len = jnp.max(sample_len).astype(jnp.int32).reshape(1)

    fuse_gates = (H % 128 == 0)
    if fuse_gates:
        gi_scratch = [pltpu.VMEM((T * B_pad, 3 * H), jnp.float32)]
    else:
        gi_scratch = [pltpu.VMEM((T * B_pad, H), jnp.float32)] * 3

    smem = pl.BlockSpec(memory_space=pltpu.MemorySpace.SMEM)
    vmem = pl.BlockSpec(memory_space=pltpu.MemorySpace.VMEM)

    stage1 = functools.partial(_gru_stage1_kernel, b_pad=B_pad, hidden=H,
                               fuse_gates=fuse_gates)
    a1 = pl.pallas_call(
        stage1,
        out_shape=jax.ShapeDtypeStruct((B_pad, H2), jnp.bfloat16),
        in_specs=[smem] + [vmem] * 8,
        out_specs=vmem,
        scratch_shapes=gi_scratch,
    )(max_len, lens, x2d, prep["wih"], prep["whh"], prep["bi"], prep["bhn"],
      prep["w1"], prep["b1"])

    # Head: stream W2 in lane-dense item tiles; grid axis is parallel so both
    # v7x TensorCores (or megacore halves) split the item dimension.
    tile_n = _pick_tile_n(I_pad)
    grid = (I_pad // tile_n,)
    out_padded = pl.pallas_call(
        _head_kernel,
        out_shape=jax.ShapeDtypeStruct((B_pad, I_pad), jnp.float32),
        grid=grid,
        in_specs=[pl.BlockSpec((B_pad, H2), lambda i: (0, 0)),
                  pl.BlockSpec((H2, tile_n), lambda i: (0, i)),
                  pl.BlockSpec((1, tile_n), lambda i: (0, i))],
        out_specs=pl.BlockSpec((B_pad, tile_n), lambda i: (0, i)),
        compiler_params=pltpu.CompilerParams(
            dimension_semantics=("parallel",),
            vmem_limit_bytes=64 * 1024 * 1024),
    )(a1, prep["w2"], prep["b2"])

    return out_padded[:B, :I]


# ----------------------------------------------------------------------------
# Pure-JAX f32 reference (module semantics, for the correctness check).
# ----------------------------------------------------------------------------
def reference_forward(params, item, sample_len):
    x = params["item_embedding"][item]                  # (B, T, E)
    B, T, _ = x.shape
    Wih, Whh = params["W_ih"], params["W_hh"]
    bih, bhh = params["b_ih"], params["b_hh"]
    H = Whh.shape[1]
    h = jnp.zeros((B, H), jnp.float32)
    for t in range(T):
        xt = x[:, t, :]
        gi = xt @ Wih.T + bih
        gh = h @ Whh.T + bhh
        r = jax.nn.sigmoid(gi[:, :H] + gh[:, :H])
        z = jax.nn.sigmoid(gi[:, H:2 * H] + gh[:, H:2 * H])
        n = jnp.tanh(gi[:, 2 * H:] + r * gh[:, 2 * H:])
        h_new = (1.0 - z) * n + z * h
        mask = (t < sample_len)[:, None]
        h = jnp.where(mask, h_new, h)
    a1 = jax.nn.relu(h @ params["W1"].T + params["b1"])
    return a1 @ params["W2"].T + params["b2"]


# ----------------------------------------------------------------------------
# Deterministic parameter init (shapes follow the module __init__).
# ----------------------------------------------------------------------------
def init_params(key, user_num, item_num, embed_size, hidden_size):
    E, H, I = embed_size, hidden_size, item_num
    keys = jax.random.split(key, 10)
    k = 1.0 / np.sqrt(H)

    def u(rng, shape, scale):
        return jax.random.uniform(rng, shape, jnp.float32, -scale, scale)

    item_embedding = jax.random.normal(keys[0], (I + 1, E), jnp.float32)
    item_embedding = item_embedding.at[0].set(0.0)      # padding_idx=0
    return {
        "user_embedding": jax.random.normal(keys[1], (user_num, E), jnp.float32),
        "item_embedding": item_embedding,
        "W_ih": u(keys[2], (3 * H, E), k),
        "W_hh": u(keys[3], (3 * H, H), k),
        "b_ih": u(keys[4], (3 * H,), k),
        "b_hh": u(keys[5], (3 * H,), k),
        "W1": u(keys[6], (H // 2, H), 1.0 / np.sqrt(H)),
        "b1": u(keys[7], (H // 2,), 1.0 / np.sqrt(H)),
        "W2": u(keys[8], (I, H // 2), 1.0 / np.sqrt(H // 2)),
        "b2": u(keys[9], (I,), 1.0 / np.sqrt(H // 2)),
    }


if __name__ == "__main__":
    # Small config: embed_size=16, hidden_size=32, user_num=10, item_num=20
    B, T, E, H = 4, 8, 16, 32
    USER_NUM, ITEM_NUM = 10, 20

    key = jax.random.PRNGKey(0)
    pkey, ukey, ikey = jax.random.split(key, 3)
    params = init_params(pkey, USER_NUM, ITEM_NUM, E, H)
    prep = prepare_params(params)                        # one-time weight prep

    # lengths sorted descending (pack_padded_sequence enforce_sorted=True)
    sample_len = jnp.array([8, 6, 5, 3], dtype=jnp.int32)
    user = jax.random.randint(ukey, (B,), 0, USER_NUM)
    item = jax.random.randint(ikey, (B, T), 1, ITEM_NUM + 1)
    # zero-pad (padding_idx=0) beyond the valid length of each sequence
    t_idx = jnp.arange(T)[None, :]
    item = jnp.where(t_idx < sample_len[:, None], item, 0)
    behavior = jnp.zeros((B, T), dtype=jnp.int32)        # unused in forward

    scores = vanilla_gru_forward(prep, user, item, behavior, sample_len)
    scores = jax.block_until_ready(scores)

    ref = reference_forward(params, item, sample_len)    # full-f32 reference
    assert scores.shape == (B, ITEM_NUM)
    # Kernel uses bf16 MXU operands (f32 accumulation): compare loosely vs f32.
    np.testing.assert_allclose(np.asarray(scores), np.asarray(ref),
                               rtol=5e-2, atol=5e-2)
    print("KERNEL_OK")
</pallas_src>

<mosaic_0001>
module attributes {stable_mosaic.version = 11 : i64} {
  func.func @_gru_stage1_kernel(%arg0: memref<1xi32, #tpu.memory_space<smem>>, %arg1: memref<16x1xi32, #tpu.memory_space<vmem>>, %arg2: memref<128x16xbf16, #tpu.memory_space<vmem>>, %arg3: memref<16x96xbf16, #tpu.memory_space<vmem>>, %arg4: memref<32x96xbf16, #tpu.memory_space<vmem>>, %arg5: memref<1x96xf32, #tpu.memory_space<vmem>>, %arg6: memref<1x32xf32, #tpu.memory_space<vmem>>, %arg7: memref<32x16xbf16, #tpu.memory_space<vmem>>, %arg8: memref<1x16xf32, #tpu.memory_space<vmem>>, %arg9: memref<16x16xbf16, #tpu.memory_space<vmem>>, %arg10: memref<128x32xf32, #tpu.memory_space<vmem>>, %arg11: memref<128x32xf32, #tpu.memory_space<vmem>>, %arg12: memref<128x32xf32, #tpu.memory_space<vmem>>) attributes {dimension_semantics = [], scalar_prefetch = 0 : i64, scratch_operands = 3 : i64, tpu.core_type = #tpu.core_type<tc>} {
    %c0 = arith.constant 0 : index
    %c0_0 = arith.constant 0 : index
    %0 = vector.load %arg2[%c0, %c0_0] : memref<128x16xbf16, #tpu.memory_space<vmem>>, vector<128x16xbf16>
    %c0_1 = arith.constant 0 : index
    %c0_2 = arith.constant 0 : index
    %1 = vector.load %arg3[%c0_1, %c0_2] : memref<16x96xbf16, #tpu.memory_space<vmem>>, vector<16x96xbf16>
    %c0_3 = arith.constant 0 : index
    %c0_4 = arith.constant 0 : index
    %2 = vector.load %arg5[%c0_3, %c0_4] : memref<1x96xf32, #tpu.memory_space<vmem>>, vector<1x96xf32>
    %3 = vector.extract_strided_slice %1 {offsets = [0, 0], sizes = [16, 32], strides = [1, 1]} : vector<16x96xbf16> to vector<16x32xbf16>
    %cst = arith.constant dense<0.000000e+00> : vector<128x32xf32>
    %4 = tpu.matmul %0, %3, %cst {dimension_numbers = #tpu.dot_dimension_numbers<[1], [0], [0], [1], [0, 0, 1, 1], [], []>} : vector<128x16xbf16>, vector<16x32xbf16>, vector<128x32xf32> -> vector<128x32xf32>
    %5 = vector.extract_strided_slice %2 {offsets = [0, 0], sizes = [1, 32], strides = [1, 1]} : vector<1x96xf32> to vector<1x32xf32>
    %6 = vector.broadcast %5 : vector<1x32xf32> to vector<128x32xf32>
    %7 = arith.addf %4, %6 : vector<128x32xf32>
    %c0_5 = arith.constant 0 : index
    %c0_6 = arith.constant 0 : index
    %8 = vector.load %arg10[%c0_5, %c0_6] : memref<128x32xf32, #tpu.memory_space<vmem>>, vector<128x32xf32>
    tpu.vector_store %arg10[%c0_5, %c0_6], %7 {strides = array<i32>} : memref<128x32xf32, #tpu.memory_space<vmem>>, vector<128x32xf32>,
    %9 = vector.extract_strided_slice %1 {offsets = [0, 32], sizes = [16, 32], strides = [1, 1]} : vector<16x96xbf16> to vector<16x32xbf16>
    %cst_7 = arith.constant dense<0.000000e+00> : vector<128x32xf32>
    %10 = tpu.matmul %0, %9, %cst_7 {dimension_numbers = #tpu.dot_dimension_numbers<[1], [0], [0], [1], [0, 0, 1, 1], [], []>} : vector<128x16xbf16>, vector<16x32xbf16>, vector<128x32xf32> -> vector<128x32xf32>
    %11 = vector.extract_strided_slice %2 {offsets = [0, 32], sizes = [1, 32], strides = [1, 1]} : vector<1x96xf32> to vector<1x32xf32>
    %12 = vector.broadcast %11 : vector<1x32xf32> to vector<128x32xf32>
    %13 = arith.addf %10, %12 : vector<128x32xf32>
    %c0_8 = arith.constant 0 : index
    %c0_9 = arith.constant 0 : index
    %14 = vector.load %arg11[%c0_8, %c0_9] : memref<128x32xf32, #tpu.memory_space<vmem>>, vector<128x32xf32>
    tpu.vector_store %arg11[%c0_8, %c0_9], %13 {strides = array<i32>} : memref<128x32xf32, #tpu.memory_space<vmem>>, vector<128x32xf32>,
    %15 = vector.extract_strided_slice %1 {offsets = [0, 64], sizes = [16, 32], strides = [1, 1]} : vector<16x96xbf16> to vector<16x32xbf16>
    %cst_10 = arith.constant dense<0.000000e+00> : vector<128x32xf32>
    %16 = tpu.matmul %0, %15, %cst_10 {dimension_numbers = #tpu.dot_dimension_numbers<[1], [0], [0], [1], [0, 0, 1, 1], [], []>} : vector<128x16xbf16>, vector<16x32xbf16>, vector<128x32xf32> -> vector<128x32xf32>
    %17 = vector.extract_strided_slice %2 {offsets = [0, 64], sizes = [1, 32], strides = [1, 1]} : vector<1x96xf32> to vector<1x32xf32>
    %18 = vector.broadcast %17 : vector<1x32xf32> to vector<128x32xf32>
    %19 = arith.addf %16, %18 : vector<128x32xf32>
    %c0_11 = arith.constant 0 : index
    %c0_12 = arith.constant 0 : index
    %20 = vector.load %arg12[%c0_11, %c0_12] : memref<128x32xf32, #tpu.memory_space<vmem>>, vector<128x32xf32>
    tpu.vector_store %arg12[%c0_11, %c0_12], %19 {strides = array<i32>} : memref<128x32xf32, #tpu.memory_space<vmem>>, vector<128x32xf32>,
    %c0_13 = arith.constant 0 : index
    %c0_14 = arith.constant 0 : index
    %21 = vector.load %arg4[%c0_13, %c0_14] : memref<32x96xbf16, #tpu.memory_space<vmem>>, vector<32x96xbf16>
    %22 = vector.extract_strided_slice %21 {offsets = [0, 0], sizes = [32, 32], strides = [1, 1]} : vector<32x96xbf16> to vector<32x32xbf16>
    %23 = vector.extract_strided_slice %21 {offsets = [0, 32], sizes = [32, 32], strides = [1, 1]} : vector<32x96xbf16> to vector<32x32xbf16>
    %24 = vector.extract_strided_slice %21 {offsets = [0, 64], sizes = [32, 32], strides = [1, 1]} : vector<32x96xbf16> to vector<32x32xbf16>
    %c0_15 = arith.constant 0 : index
    %c0_16 = arith.constant 0 : index
    %25 = vector.load %arg6[%c0_15, %c0_16] : memref<1x32xf32, #tpu.memory_space<vmem>>, vector<1x32xf32>
    %c0_17 = arith.constant 0 : index
    %c0_18 = arith.constant 0 : index
    %26 = vector.load %arg1[%c0_17, %c0_18] : memref<16x1xi32, #tpu.memory_space<vmem>>, vector<16x1xi32>
    %cst_19 = arith.constant 0.000000e+00 : f32
    %27 = vector.broadcast %cst_19 : f32 to vector<16x32xf32>
    %c0_20 = arith.constant 0 : index
    %28 = memref.load %arg0[%c0_20] : memref<1xi32, #tpu.memory_space<smem>>
    %c0_i32 = arith.constant 0 : i32
    %29 = arith.subi %28, %c0_i32 : i32
    %30 = arith.addi %c0_i32, %29 : i32
    %c1_i32 = arith.constant 1 : i32
    %31 = scf.for %arg13 = %c0_i32 to %30 step %c1_i32 iter_args(%arg14 = %27) -> (vector<16x32xf32>)  : i32 {
      %c16_i32 = arith.constant 16 : i32
      %42 = arith.muli %arg13, %c16_i32 : i32
      %43 = tpu.assume_multiple %42, 16 : i32
      %44 = arith.truncf %arg14 : vector<16x32xf32> to vector<16x32xbf16>
      %45 = arith.index_cast %43 : i32 to index
      %c0_29 = arith.constant 0 : index
      %46 = vector.load %arg10[%45, %c0_29] : memref<128x32xf32, #tpu.memory_space<vmem>>, vector<16x32xf32>
      %47 = arith.index_cast %43 : i32 to index
      %c0_30 = arith.constant 0 : index
      %48 = vector.load %arg11[%47, %c0_30] : memref<128x32xf32, #tpu.memory_space<vmem>>, vector<16x32xf32>
      %49 = arith.index_cast %43 : i32 to index
      %c0_31 = arith.constant 0 : index
      %50 = vector.load %arg12[%49, %c0_31] : memref<128x32xf32, #tpu.memory_space<vmem>>, vector<16x32xf32>
      %cst_32 = arith.constant dense<0.000000e+00> : vector<16x32xf32>
      %51 = tpu.matmul %44, %22, %cst_32 {dimension_numbers = #tpu.dot_dimension_numbers<[1], [0], [0], [1], [0, 0, 1, 1], [], []>} : vector<16x32xbf16>, vector<32x32xbf16>, vector<16x32xf32> -> vector<16x32xf32>
      %cst_33 = arith.constant dense<0.000000e+00> : vector<16x32xf32>
      %52 = tpu.matmul %44, %23, %cst_33 {dimension_numbers = #tpu.dot_dimension_numbers<[1], [0], [0], [1], [0, 0, 1, 1], [], []>} : vector<16x32xbf16>, vector<32x32xbf16>, vector<16x32xf32> -> vector<16x32xf32>
      %cst_34 = arith.constant dense<0.000000e+00> : vector<16x32xf32>
      %53 = tpu.matmul %44, %24, %cst_34 {dimension_numbers = #tpu.dot_dimension_numbers<[1], [0], [0], [1], [0, 0, 1, 1], [], []>} : vector<16x32xbf16>, vector<32x32xbf16>, vector<16x32xf32> -> vector<16x32xf32>
      %54 = arith.addf %46, %51 : vector<16x32xf32>
      %55 = arith.negf %54 : vector<16x32xf32>
      %56 = math.exp %55 : vector<16x32xf32>
      %cst_35 = arith.constant 1.000000e+00 : f32
      %57 = vector.broadcast %cst_35 : f32 to vector<16x32xf32>
      %58 = arith.addf %57, %56 : vector<16x32xf32>
      %59 = arith.divf %57, %58 : vector<16x32xf32>
      %60 = arith.addf %48, %52 : vector<16x32xf32>
      %61 = arith.negf %60 : vector<16x32xf32>
      %62 = math.exp %61 : vector<16x32xf32>
      %cst_36 = arith.constant 1.000000e+00 : f32
      %63 = vector.broadcast %cst_36 : f32 to vector<16x32xf32>
      %64 = arith.addf %63, %62 : vector<16x32xf32>
      %65 = arith.divf %63, %64 : vector<16x32xf32>
      %66 = vector.broadcast %25 : vector<1x32xf32> to vector<16x32xf32>
      %67 = arith.addf %53, %66 : vector<16x32xf32>
      %68 = arith.mulf %59, %67 : vector<16x32xf32>
      %69 = arith.addf %50, %68 : vector<16x32xf32>
      %70 = math.tanh %69 : vector<16x32xf32>
      %cst_37 = arith.constant 1.000000e+00 : f32
      %71 = vector.broadcast %cst_37 : f32 to vector<16x32xf32>
      %72 = arith.subf %71, %65 : vector<16x32xf32>
      %73 = arith.mulf %72, %70 : vector<16x32xf32>
      %74 = arith.mulf %65, %arg14 : vector<16x32xf32>
      %75 = arith.addf %73, %74 : vector<16x32xf32>
      %76 = vector.broadcast %arg13 : i32 to vector<16x1xi32>
      %77 = arith.cmpi sgt, %26, %76 : vector<16x1xi32>
      %78 = vector.shape_cast %77 : vector<16x1xi1> to vector<16x1xi1>
      %79 = vector.broadcast %78 : vector<16x1xi1> to vector<16x32xi1>
      %80 = arith.select %79, %75, %arg14 : vector<16x32xi1>, vector<16x32xf32>
      scf.yield %80 : vector<16x32xf32>
    }
    %32 = arith.truncf %31 : vector<16x32xf32> to vector<16x32xbf16>
    %c0_21 = arith.constant 0 : index
    %c0_22 = arith.constant 0 : index
    %33 = vector.load %arg7[%c0_21, %c0_22] : memref<32x16xbf16, #tpu.memory_space<vmem>>, vector<32x16xbf16>
    %cst_23 = arith.constant dense<0.000000e+00> : vector<16x16xf32>
    %34 = tpu.matmul %32, %33, %cst_23 {dimension_numbers = #tpu.dot_dimension_numbers<[1], [0], [0], [1], [0, 0, 1, 1], [], []>} : vector<16x32xbf16>, vector<32x16xbf16>, vector<16x16xf32> -> vector<16x16xf32>
    %c0_24 = arith.constant 0 : index
    %c0_25 = arith.constant 0 : index
    %35 = vector.load %arg8[%c0_24, %c0_25] : memref<1x16xf32, #tpu.memory_space<vmem>>, vector<1x16xf32>
    %36 = vector.broadcast %35 : vector<1x16xf32> to vector<16x16xf32>
    %37 = arith.addf %34, %36 : vector<16x16xf32>
    %cst_26 = arith.constant 0.000000e+00 : f32
    %38 = vector.broadcast %cst_26 : f32 to vector<16x16xf32>
    %39 = arith.maximumf %37, %38 : vector<16x16xf32>
    %40 = arith.truncf %39 : vector<16x16xf32> to vector<16x16xbf16>
    %c0_27 = arith.constant 0 : index
    %c0_28 = arith.constant 0 : index
    %41 = vector.load %arg9[%c0_27, %c0_28] : memref<16x16xbf16, #tpu.memory_space<vmem>>, vector<16x16xbf16>
    tpu.vector_store %arg9[%c0_27, %c0_28], %40 {strides = array<i32>} : memref<16x16xbf16, #tpu.memory_space<vmem>>, vector<16x16xbf16>,
    return
  }
}

</mosaic_0001>

<bundles_post_ra>
// kernel: tpu_custom_call.1
= control target key start
LH: loop header
LB: loop body
LE: loop exit
PB: predicated region body
PF: predicated region fallthrough
CT: control target
= control target key end

     0   :  { %s1500_s0 = inlined_call_operand.<no memory space> [shape: s32[1], index: 0, kind: input, shape index: {}]   ;;  %s1501_s1 = inlined_call_operand.vmem [shape: s32[16,1], index: 1, kind: input, shape index: {}]   ;;  %s1502_s2 = inlined_call_operand.vmem [shape: bf16[128,16], index: 2, kind: input, shape index: {}]   ;;  %s1503_s3 = inlined_call_operand.vmem [shape: bf16[16,96], index: 3, kind: input, shape index: {}]   ;;  %s1504_s4 = inlined_call_operand.vmem [shape: bf16[32,96], index: 4, kind: input, shape index: {}]   ;;  %s1505_s5 = inlined_call_operand.vmem [shape: f32[1,96], index: 5, kind: input, shape index: {}]   ;;  %s1506_s6 = inlined_call_operand.vmem [shape: f32[1,32], index: 6, kind: input, shape index: {}]   ;;  %s1507_s7 = inlined_call_operand.vmem [shape: bf16[32,16], index: 7, kind: input, shape index: {}]   ;;  %s1508_s8 = inlined_call_operand.vmem [shape: f32[1,16], index: 8, kind: input, shape index: {}]   ;;  %s1509_s9 = inlined_call_operand.hbm [shape: bf16[16,16], index: 9, kind: output, shape index: {}]  }
   0x1   :  { %v1069_v0 = vld [vmem:[%s1503_s3] sm:$0xff]  }
   0x2   :  { %15 = vsyncpa [#allocation7], 0  ;;  %v1070_v1 = vld [vmem:[%s1502_s2] sm:$0xff]   ;;  %s1164_s13 = smov 96   ;;  %930 = vmatprep.subr.bf16.mxu0 %v1069_v0  ;;  %vm106_vm0 = vcmask 130048   ;;  %1016 = vmatprep.subr.bf16.mxu1 %v1069_v0  ;;  %v1072_v3 = vld [vmem:[%s1502_s2 + $0x8] sm:$0xff]  }
   0x3   :  { %245 = vrot.lane.b32.xlu0 %v1069_v0, %s1164_s13  ;;  %v1071_v2 = vld [vmem:[%s1502_s2 + $0x20] sm:$0xff]   ;;  %931 = vmatpush3.bf16.msra.mxu0 %v1069_v0  ;;  %v1073_v4 = vld [vmem:[%s1502_s2 + $0x28] sm:$0xff]   ;;  %s1165_s19 = smov 64   ;;  %v1074_v5 = vld [vmem:[%s1502_s2 + $0x10] sm:$0xff]   ;;  %vm228_vm1 = vcmask 261120   ;;  %p871_p0 = scmp.le.s32.totalorder %s1500_s0, 0 }
   0x4   :  { %1017 = vmatpush3.bf16.msra.mxu1 %v1069_v0  ;;  %932 = vmatprep.mubr.msk.bf16.mxu0 %vm106_vm0, %v1070_v1  ;;  %v1075_v6 = vld [vmem:[%s1502_s2 + $0x30] sm:$0xff]   ;;  %v1076_v7 = vld [vmem:[%s1502_s2 + $0x18] sm:$0xff]   ;;  %v1266_v9 = vld [vmem:[%s1505_s5] ss:$0 sm:$0xff] }
   0x5   :  { %940 = vmatprep.mubr.msk.bf16.mxu1 %vm106_vm0, %v1071_v2  ;;  %v1077_v8 = vld [vmem:[%s1502_s2 + $0x38] sm:$0xff]   ;;  %248 = vrot.lane.b32.xlu1 %v1266_v9, %s1164_s13  ;;  %v1320_v44 = vld [vmem:[%s1504_s4] sm:$0xf]  ;;  %v1325_v45 = vld [vmem:[%s1504_s4 + $0x4] sm:$0xf] }
   0x6   :  { %933 = vmatmul.mubr.msk.bf16.vlgmr.msra.gmra.mxu0 %vm106_vm0, %v1072_v3  ;;  %v1330_v46 = vld [vmem:[%s1504_s4 + $0x8] sm:$0xf]  ;;  %v1335_v47 = vld [vmem:[%s1504_s4 + $0xc] sm:$0xf]  ;;  %v1340_v48 = vld [vmem:[%s1506_s6] ss:$0 sm:$0xff] }
   0x7   :  { %364 = vrot.lane.b32.xlu0 %v1069_v0, %s1165_s19  ;;  %941 = vmatmul.mubr.msk.bf16.vlgmr.msra.gmra.mxu1 %vm106_vm0, %v1073_v4  ;;  %v1345_v49 = vld [vmem:[%s1501_s1] sm:$0xff]  ;;  %v1350_v50 = vld [vmem:[%s1501_s1 + $0x8] sm:$0xff]  ;;  %s1431_s6 = smov (!%p871_p0), 0  }
   0x8   :  { %936 = vmatprep.mubr.msk.bf16.mxu0 %vm106_vm0, %v1074_v5  ;;  %944 = vmatprep.mubr.msk.bf16.mxu1 %vm106_vm0, %v1075_v6 }
   0x9   :  { %367 = vrot.lane.b32.xlu1 %v1266_v9, %s1165_s19 }
   0xe   :  { %937 = vmatmul.mubr.msk.bf16.gmra.mxu0 %vm106_vm0, %v1076_v7 }
   0xf   :  { %945 = vmatmul.mubr.msk.bf16.gmra.mxu1 %vm106_vm0, %v1077_v8  ;;  %968 = vmatprep.mubr.msk.bf16.mxu0 %vm106_vm0, %v1070_v1 }
  0x10   :  { %950 = vmatprep.mubr.msk.bf16.mxu1 %vm106_vm0, %v1070_v1 }
  0x75   :  { %v246_v10 = vpop.permute.xlu0 %245 }
  0x76   :  { %948 = vmatprep.subr.bf16.mxu1 %v246_v10 }
  0x77   :  { %949 = vmatpush3.bf16.msra.mxu1 %v246_v10  ;;  %v1352_v51 = vpop.permute.xlu1 %248 }
  0x79   :  { %v365_v11 = vpop.permute.xlu0 %364 }
  0x7a   :  { %966 = vmatprep.subr.bf16.mxu0 %v365_v11  ;;  %951 = vmatmul.mubr.msk.bf16.vlgmr.msra.gmra.mxu1 %vm106_vm0, %v1072_v3 }
  0x7b   :  { %967 = vmatpush3.bf16.msra.mxu0 %v365_v11  ;;  %954 = vmatprep.mubr.msk.bf16.mxu1 %vm106_vm0, %v1074_v5  ;;  %v1355_v55 = vpop.permute.xlu1 %367 }
  0x7e   :  { %969 = vmatmul.mubr.msk.bf16.vlgmr.msra.gmra.mxu0 %vm106_vm0, %v1072_v3 }
  0x7f   :  { %972 = vmatprep.mubr.msk.bf16.mxu0 %vm106_vm0, %v1074_v5 }
  0x82   :  { %955 = vmatmul.mubr.msk.bf16.gmra.mxu1 %vm106_vm0, %v1076_v7 }
  0x83   :  { %958 = vmatprep.mubr.msk.bf16.mxu1 %vm106_vm0, %v1071_v2 }
  0x86   :  { %973 = vmatmul.mubr.msk.bf16.gmra.mxu0 %vm106_vm0, %v1076_v7 }
  0x87   :  { %976 = vmatprep.mubr.msk.bf16.mxu0 %vm106_vm0, %v1071_v2 }
  0x8a   :  { %959 = vmatmul.mubr.msk.bf16.gmra.mxu1 %vm106_vm0, %v1073_v4 }
  0x8b   :  { %962 = vmatprep.mubr.msk.bf16.mxu1 %vm106_vm0, %v1075_v6 }
  0x8e   :  { %977 = vmatmul.mubr.msk.bf16.gmra.mxu0 %vm106_vm0, %v1073_v4 }
  0x8f   :  { %980 = vmatprep.mubr.msk.bf16.mxu0 %vm106_vm0, %v1075_v6 }
  0x92   :  { %963 = vmatmul.mubr.msk.bf16.gmra.mxu1 %vm106_vm0, %v1077_v8 }
  0x96   :  { %981 = vmatmul.mubr.msk.bf16.gmra.mxu0 %vm106_vm0, %v1077_v8 }
  0xc6   :  { %v934_v12 = vpop.f32.mrf.mxu0 }
  0xc7   :  { %v174_v13 = vadd.f32 %v934_v12, %v1266_v9  ;;  %v942_v14 = vpop.f32.mrf.mxu1 }
  0xc8   :  { %v206_v15 = vadd.f32 %v942_v14, %v1266_v9  ;;  %v165_v16 = vpop.f32.mrf.mxu0 }
  0xc9   :  { %231 = vst.msk [vmem:[#allocation2 + $0x10] sm:$0xff] %vm228_vm1, %v174_v13  ;;  %v166_v17 = vadd.f32 %v1266_v9, %v165_v16  ;;  %v197_v18 = vpop.f32.mrf.mxu1 }
  0xca   :  { %239 = vst.msk [vmem:[#allocation2 + $0x50] sm:$0xff] %vm228_vm1, %v206_v15  ;;  %v198_v19 = vadd.f32 %v1266_v9, %v197_v18  ;;  %v935_v20 = vpop.f32.mrf.mxu0 }
  0xcb   :  { %229 = vst.msk [vmem:[#allocation2] sm:$0xff] %vm228_vm1, %v166_v17  ;;  %v177_v21 = vadd.f32 %v935_v20, %v1266_v9  ;;  %v943_v22 = vpop.f32.mrf.mxu1 }
  0xcc   :  { %237 = vst.msk [vmem:[#allocation2 + $0x40] sm:$0xff] %vm228_vm1, %v198_v19  ;;  %v209_v23 = vadd.f32 %v943_v22, %v1266_v9  ;;  %v168_v24 = vpop.f32.mrf.mxu0 }
  0xcd   :  { %232 = vst.msk [vmem:[#allocation2 + $0x18] sm:$0xff] %vm228_vm1, %v177_v21  ;;  %v169_v25 = vadd.f32 %v1266_v9, %v168_v24  ;;  %v200_v26 = vpop.f32.mrf.mxu1 }
  0xce   :  { %240 = vst.msk [vmem:[#allocation2 + $0x58] sm:$0xff] %vm228_vm1, %v209_v23  ;;  %v201_v27 = vadd.f32 %v1266_v9, %v200_v26  ;;  %v938_v28 = vpop.f32.mrf.mxu0 }
  0xcf   :  { %230 = vst.msk [vmem:[#allocation2 + $0x8] sm:$0xff] %vm228_vm1, %v169_v25  ;;  %v190_v29 = vadd.f32 %v938_v28, %v1266_v9  ;;  %v946_v30 = vpop.f32.mrf.mxu1 }
  0xd0   :  { %238 = vst.msk [vmem:[#allocation2 + $0x48] sm:$0xff] %vm228_vm1, %v201_v27  ;;  %v222_v31 = vadd.f32 %v946_v30, %v1266_v9  ;;  %v181_v32 = vpop.f32.mrf.mxu0 }
  0xd1   :  { %235 = vst.msk [vmem:[#allocation2 + $0x30] sm:$0xff] %vm228_vm1, %v190_v29  ;;  %v182_v33 = vadd.f32 %v1266_v9, %v181_v32  ;;  %v213_v34 = vpop.f32.mrf.mxu1 }
  0xd2   :  { %243 = vst.msk [vmem:[#allocation2 + $0x70] sm:$0xff] %vm228_vm1, %v222_v31  ;;  %v214_v35 = vadd.f32 %v1266_v9, %v213_v34  ;;  %v939_v36 = vpop.f32.mrf.mxu0 }
  0xd3   :  { %233 = vst.msk [vmem:[#allocation2 + $0x20] sm:$0xff] %vm228_vm1, %v182_v33  ;;  %v193_v37 = vadd.f32 %v939_v36, %v1266_v9  ;;  %v947_v38 = vpop.f32.mrf.mxu1 }
  0xd4   :  { %241 = vst.msk [vmem:[#allocation2 + $0x60] sm:$0xff] %vm228_vm1, %v214_v35  ;;  %v225_v39 = vadd.f32 %v947_v38, %v1266_v9  ;;  %v184_v40 = vpop.f32.mrf.mxu0 }
  0xd5   :  { %236 = vst.msk [vmem:[#allocation2 + $0x38] sm:$0xff] %vm228_vm1, %v193_v37  ;;  %v185_v41 = vadd.f32 %v1266_v9, %v184_v40  ;;  %v216_v42 = vpop.f32.mrf.mxu1 }
  0xd6   :  { %244 = vst.msk [vmem:[#allocation2 + $0x78] sm:$0xff] %vm228_vm1, %v225_v39  ;;  %v217_v43 = vadd.f32 %v1266_v9, %v216_v42 }
  0xd7   :  { %234 = vst.msk [vmem:[#allocation2 + $0x28] sm:$0xff] %vm228_vm1, %v185_v41 }
  0xd8   :  { %242 = vst.msk [vmem:[#allocation2 + $0x68] sm:$0xff] %vm228_vm1, %v217_v43 }
 0x13a   :  { %v952_v52 = vpop.f32.mrf.mxu1 }
 0x13b   :  { %v294_v53 = vadd.f32 %v952_v52, %v1352_v51 }
 0x13c   :  { %v285_v54 = vpop.f32.mrf.mxu1 }
 0x13d   :  { %350 = vst.msk [vmem:[#allocation3 + $0x10] sm:$0xff] %vm228_vm1, %v294_v53  ;;  %v286_v56 = vadd.f32 %v285_v54, %v1352_v51 }
 0x13e   :  { %v970_v57 = vpop.f32.mrf.mxu0  ;;  %v953_v58 = vpop.f32.mrf.mxu1 }
 0x13f   :  { %348 = vst.msk [vmem:[#allocation3] sm:$0xff] %vm228_vm1, %v286_v56  ;;  %v297_v59 = vadd.f32 %v953_v58, %v1352_v51  ;;  %v413_v60 = vadd.f32 %v970_v57, %v1355_v55 }
 0x140   :  { %v404_v61 = vpop.f32.mrf.mxu0  ;;  %v288_v62 = vpop.f32.mrf.mxu1 }
 0x141   :  { %351 = vst.msk [vmem:[#allocation3 + $0x18] sm:$0xff] %vm228_vm1, %v297_v59  ;;  %v405_v63 = vadd.f32 %v404_v61, %v1355_v55  ;;  %469 = vst.msk [vmem:[#allocation4 + $0x10] sm:$0xff] %vm228_vm1, %v413_v60  ;;  %v289_v0 = vadd.f32 %v288_v62, %v1352_v51  ;;  %v1423_v62 = vmov 0.0  }
 0x142   :  { %v971_v1 = vpop.f32.mrf.mxu0  ;;  %v956_v2 = vpop.f32.mrf.mxu1 }
 0x143   :  { %v416_v3 = vadd.f32 %v971_v1, %v1355_v55  ;;  %467 = vst.msk [vmem:[#allocation4] sm:$0xff] %vm228_vm1, %v405_v63  ;;  %349 = vst.msk [vmem:[#allocation3 + $0x8] sm:$0xff] %vm228_vm1, %v289_v0  ;;  %v310_v4 = vadd.f32 %v956_v2, %v1352_v51 }
 0x144   :  { %v407_v5 = vpop.f32.mrf.mxu0  ;;  %v301_v6 = vpop.f32.mrf.mxu1 }
 0x145   :  { %470 = vst.msk [vmem:[#allocation4 + $0x18] sm:$0xff] %vm228_vm1, %v416_v3  ;;  %v408_v7 = vadd.f32 %v407_v5, %v1355_v55  ;;  %354 = vst.msk [vmem:[#allocation3 + $0x30] sm:$0xff] %vm228_vm1, %v310_v4  ;;  %v302_v8 = vadd.f32 %v301_v6, %v1352_v51 }
 0x146   :  { %v974_v9 = vpop.f32.mrf.mxu0  ;;  %v957_v10 = vpop.f32.mrf.mxu1 }
 0x147   :  { %468 = vst.msk [vmem:[#allocation4 + $0x8] sm:$0xff] %vm228_vm1, %v408_v7  ;;  %v429_v11 = vadd.f32 %v974_v9, %v1355_v55  ;;  %352 = vst.msk [vmem:[#allocation3 + $0x20] sm:$0xff] %vm228_vm1, %v302_v8  ;;  %v313_v12 = vadd.f32 %v957_v10, %v1352_v51 }
 0x148   :  { %v420_v13 = vpop.f32.mrf.mxu0  ;;  %v304_v14 = vpop.f32.mrf.mxu1 }
 0x149   :  { %473 = vst.msk [vmem:[#allocation4 + $0x30] sm:$0xff] %vm228_vm1, %v429_v11  ;;  %v421_v15 = vadd.f32 %v420_v13, %v1355_v55  ;;  %355 = vst.msk [vmem:[#allocation3 + $0x38] sm:$0xff] %vm228_vm1, %v313_v12  ;;  %v305_v16 = vadd.f32 %v304_v14, %v1352_v51 }
 0x14a   :  { %v975_v17 = vpop.f32.mrf.mxu0  ;;  %v960_v18 = vpop.f32.mrf.mxu1 }
 0x14b   :  { %471 = vst.msk [vmem:[#allocation4 + $0x20] sm:$0xff] %vm228_vm1, %v421_v15  ;;  %v432_v19 = vadd.f32 %v975_v17, %v1355_v55  ;;  %353 = vst.msk [vmem:[#allocation3 + $0x28] sm:$0xff] %vm228_vm1, %v305_v16  ;;  %v326_v20 = vadd.f32 %v960_v18, %v1352_v51 }
 0x14c   :  { %v423_v21 = vpop.f32.mrf.mxu0  ;;  %v317_v22 = vpop.f32.mrf.mxu1 }
 0x14d   :  { %474 = vst.msk [vmem:[#allocation4 + $0x38] sm:$0xff] %vm228_vm1, %v432_v19  ;;  %v424_v23 = vadd.f32 %v423_v21, %v1355_v55  ;;  %358 = vst.msk [vmem:[#allocation3 + $0x50] sm:$0xff] %vm228_vm1, %v326_v20  ;;  %v318_v24 = vadd.f32 %v317_v22, %v1352_v51 }
 0x14e   :  { %v978_v25 = vpop.f32.mrf.mxu0  ;;  %v961_v26 = vpop.f32.mrf.mxu1 }
 0x14f   :  { %472 = vst.msk [vmem:[#allocation4 + $0x28] sm:$0xff] %vm228_vm1, %v424_v23  ;;  %v445_v27 = vadd.f32 %v978_v25, %v1355_v55  ;;  %356 = vst.msk [vmem:[#allocation3 + $0x40] sm:$0xff] %vm228_vm1, %v318_v24  ;;  %v329_v28 = vadd.f32 %v961_v26, %v1352_v51 }
 0x150   :  { %v436_v29 = vpop.f32.mrf.mxu0  ;;  %v320_v30 = vpop.f32.mrf.mxu1 }
 0x151   :  { %477 = vst.msk [vmem:[#allocation4 + $0x50] sm:$0xff] %vm228_vm1, %v445_v27  ;;  %v437_v31 = vadd.f32 %v436_v29, %v1355_v55  ;;  %359 = vst.msk [vmem:[#allocation3 + $0x58] sm:$0xff] %vm228_vm1, %v329_v28  ;;  %v321_v32 = vadd.f32 %v320_v30, %v1352_v51 }
 0x152   :  { %v979_v33 = vpop.f32.mrf.mxu0  ;;  %v964_v34 = vpop.f32.mrf.mxu1 }
 0x153   :  { %475 = vst.msk [vmem:[#allocation4 + $0x40] sm:$0xff] %vm228_vm1, %v437_v31  ;;  %v448_v35 = vadd.f32 %v979_v33, %v1355_v55  ;;  %357 = vst.msk [vmem:[#allocation3 + $0x48] sm:$0xff] %vm228_vm1, %v321_v32  ;;  %v342_v36 = vadd.f32 %v964_v34, %v1352_v51 }
 0x154   :  { %v439_v37 = vpop.f32.mrf.mxu0  ;;  %v333_v38 = vpop.f32.mrf.mxu1 }
 0x155   :  { %478 = vst.msk [vmem:[#allocation4 + $0x58] sm:$0xff] %vm228_vm1, %v448_v35  ;;  %v440_v39 = vadd.f32 %v439_v37, %v1355_v55  ;;  %362 = vst.msk [vmem:[#allocation3 + $0x70] sm:$0xff] %vm228_vm1, %v342_v36  ;;  %v334_v40 = vadd.f32 %v333_v38, %v1352_v51 }
 0x156   :  { %v982_v41 = vpop.f32.mrf.mxu0  ;;  %v965_v42 = vpop.f32.mrf.mxu1 }
 0x157   :  { %476 = vst.msk [vmem:[#allocation4 + $0x48] sm:$0xff] %vm228_vm1, %v440_v39  ;;  %v461_v43 = vadd.f32 %v982_v41, %v1355_v55  ;;  %360 = vst.msk [vmem:[#allocation3 + $0x60] sm:$0xff] %vm228_vm1, %v334_v40  ;;  %v345_v52 = vadd.f32 %v965_v42, %v1352_v51 }
 0x158   :  { %v452_v53 = vpop.f32.mrf.mxu0  ;;  %v336_v54 = vpop.f32.mrf.mxu1 }
 0x159   :  { %481 = vst.msk [vmem:[#allocation4 + $0x70] sm:$0xff] %vm228_vm1, %v461_v43  ;;  %v453_v56 = vadd.f32 %v452_v53, %v1355_v55  ;;  %363 = vst.msk [vmem:[#allocation3 + $0x78] sm:$0xff] %vm228_vm1, %v345_v52  ;;  %v337_v57 = vadd.f32 %v336_v54, %v1352_v51  ;;  %v1425_v51 = vmov 0.0  }
 0x15a   :  { %v983_v58 = vpop.f32.mrf.mxu0 }
 0x15b   :  { %479 = vst.msk [vmem:[#allocation4 + $0x60] sm:$0xff] %vm228_vm1, %v453_v56  ;;  %v464_v59 = vadd.f32 %v983_v58, %v1355_v55  ;;  %361 = vst.msk [vmem:[#allocation3 + $0x68] sm:$0xff] %vm228_vm1, %v337_v57  ;;  %830 = sbr.rel (%p871_p0) target bundleno = 716 (0x2cc), region = 60 }
 0x15c   :  { %v455_v60 = vpop.f32.mrf.mxu0 }
 0x15d   :  { %482 = vst.msk [vmem:[#allocation4 + $0x78] sm:$0xff] %vm228_vm1, %v464_v59  ;;  %v456_v61 = vadd.f32 %v455_v60, %v1355_v55 }
 0x15f   :  { %480 = vst.msk [vmem:[#allocation4 + $0x68] sm:$0xff] %vm228_vm1, %v456_v61 }
 0x160   :  { %v1427_v63 = vmov 0.0   ;;  %v1429_v0 = vmov 0.0  }
 0x161 LB: > { %v874_v55 = vcombine.low %v1330_v46, %v1335_v47  ;;  %v1166_v1 = vmov 0.0   ;;  %vm1167_vm2 = vmmov 0   ;;  %s1168_s21 = smov 96   ;;  %v873_v2 = vcombine.low %v1320_v44, %v1325_v45  ;;  %s1169_s22 = smov 64   ;;  %s1154_s6 = sphi %s1431_s6, %s494_s6   ;;  %v1150_v0 = vphi %v1429_v0, %v1511_v0   ;;  %v1146_v63 = vphi %v1427_v63, %v1510_v63  }
 0x162   : > { %984 = vmatprep.subr.bf16.mxu0 %v1166_v1  ;;  %988 = vmatprep.mubr.msk.bf16.mxu0 %vm1167_vm2, %v1166_v1  ;;  %v708_v3 = vstv %s1154_s6  ;;  %v1170_v4 = vmov 0   ;;  %v500_v5 = vpack.c.bf16 %v1146_v63, %v1150_v0  ;;  %s1458_s23 = sshll.u32 %s1154_s6, 4  ;;  %s494_s6 = sadd.s32 1, %s1154_s6  }
 0x163   : > { %568 = vrot.lane.b32.xlu0 %v874_v55, %s1168_s21  ;;  %649 = vrot.lane.b32.xlu1 %v874_v55, %s1169_s22  ;;  %vm709_vm3 = vcmp.gt.s32.totalorder %v1345_v49, %v708_v3  ;;  %vm710_vm4 = vcmp.gt.s32.totalorder %v1350_v50, %v708_v3  ;;  %s501_s24 = scalar_lea.vmem [#allocation2], %s1458_s23  ;;  %s504_s25 = scalar_lea.vmem [#allocation3], %s1458_s23 }
 0x164   : > { %985 = vmatpush3.bf16.msra.mxu0 %v874_v55  ;;  %992 = vmatprep.subr.bf16.mxu1 %v1166_v1  ;;  %v711_v6 = vsel %vm709_vm3, 1, %v1170_v4  ;;  %v712_v7 = vsel %vm710_vm4, 1, %v1170_v4  ;;  %v502_v12 = vld [vmem:[%s501_s24] sm:$0xff]  ;;  %v503_v16 = vld [vmem:[%s501_s24 + $0x8] sm:$0xff]  ;;  %s507_s26 = scalar_lea.vmem [#allocation4], %s1458_s23  ;;  %p493_p1 = scmp.ge.s32.totalorder %s494_s6, %s1500_s0 }
 0x165   : > { %986 = vmatprep.subr.bf16.mxu0 %v1166_v1  ;;  %996 = vmatprep.mubr.msk.bf16.mxu1 %vm1167_vm2, %v1166_v1  ;;  %v505_v26 = vld [vmem:[%s504_s25] sm:$0xff]  ;;  %v506_v33 = vld [vmem:[%s504_s25 + $0x8] sm:$0xff] }
 0x166   : > { %1078 = vset.pattern.permute.xlu0 %v1170_v4  ;;  %1079 = vset.pattern.permute.xlu1 %v1170_v4  ;;  %v508_v34 = vld [vmem:[%s507_s26] sm:$0xff]  ;;  %v509_v53 = vld [vmem:[%s507_s26 + $0x8] sm:$0xff] }
 0x167   : > { %566 = vrot.lane.b32.xlu0 %v873_v2, %s1168_s21  ;;  %647 = vrot.lane.b32.xlu1 %v873_v2, %s1169_s22 }
 0x168   : > { %987 = vmatpush3.bf16.msra.mxu0 %v873_v2 }
 0x169   : > { %1000 = vmatprep.subr.bf16.mxu0 %v1166_v1 }
 0x16b   : > { %989 = vmatmul.mubr.msk.bf16.vlgmr.msra.gmra.mxu0 %vm228_vm1, %v500_v5  ;;  %714 = vperm.xlu0 %1078, %v711_v6  }
 0x16c   : > { %1004 = vmatprep.mubr.msk.bf16.mxu0 %vm1167_vm2, %v1166_v1  ;;  %717 = vperm.xlu1 %1079, %v712_v7  }
 0x1d5   : > { %v569_v8 = vpop.permute.xlu0 %568  ;;  %v650_v9 = vpop.permute.xlu1 %649 }
 0x1d6   : > { %993 = vmatpush3.bf16.msra.mxu1 %v569_v8  ;;  %1001 = vmatpush3.bf16.msra.mxu0 %v650_v9 }
 0x1d7   : > { %994 = vmatprep.subr.bf16.mxu1 %v1166_v1  ;;  %1002 = vmatprep.subr.bf16.mxu0 %v1166_v1 }
 0x1d9   : > { %v567_v10 = vpop.permute.xlu0 %566  ;;  %v648_v11 = vpop.permute.xlu1 %647 }
 0x1da   : > { %995 = vmatpush3.bf16.msra.mxu1 %v567_v10  ;;  %1003 = vmatpush3.bf16.msra.mxu0 %v648_v11 }
 0x1dd   : > { %997 = vmatmul.mubr.msk.bf16.vlgmr.msra.gmra.mxu1 %vm228_vm1, %v500_v5  ;;  %1005 = vmatmul.mubr.msk.bf16.vlgmr.msra.gmra.mxu0 %vm228_vm1, %v500_v5 }
 0x1e6   : > { %v715_v1 = vpop.permute.xlu0 %714 }
 0x1e7   : > { %vm719_vm5 = vcmp.eq.s32.totalorder %v715_v1, 1  ;;  %v718_v7 = vpop.permute.xlu1 %717 }
 0x1e8   : > { %vm720_vm6 = vcmp.eq.s32.totalorder %v718_v7, 1 }
 0x22b   : > { %v559_v13 = vpop.f32.mrf.mxu0 }
 0x22c   : > { %v613_v14 = vadd.f32 %v559_v13, %v502_v12 }
 0x22d   : > { %v990_v15 = vpop.f32.mrf.mxu0 }
 0x22e   : > { %v877_v20 = vmul.f32 -1.442695, %v613_v14 }
 0x22f   : > { %v562_v17 = vpop.f32.mrf.mxu0 }
 0x230   : > { %v614_v18 = vadd.f32 %v562_v17, %v503_v16  ;;  %1080 = vpow2.f32 %v877_v20 }
 0x231   : > { %v991_v19 = vpop.f32.mrf.mxu0 }
 0x232   : > { %v878_v21 = vmul.f32 -1.442695, %v614_v18 }
 0x234   : > { %1082 = vpow2.f32 %v878_v21 }
 0x23d   : > { %v1081_v22 = vpop.eup %1080 }
 0x23e   : > { %v621_v23 = vadd.f32 1.0, %v1081_v22 }
 0x240   : > { %1084 = vrcp.f32 %v621_v23 }
 0x241   : > { %v1083_v24 = vpop.eup %1082 }
 0x242   : > { %v622_v25 = vadd.f32 1.0, %v1083_v24 }
 0x244   : > { %1086 = vrcp.f32 %v622_v25 }
 0x24d   : > { %v1085_v27 = vpop.eup %1084 }
 0x251   : > { %v1087_v38 = vpop.eup %1086 }
 0x29d   : > { %v606_v28 = vpop.f32.mrf.mxu1  ;;  %v687_v29 = vpop.f32.mrf.mxu0 }
 0x29e   : > { %v627_v30 = vadd.f32 %v606_v28, %v505_v26  ;;  %v688_v31 = vadd.f32 %v1340_v48, %v687_v29 }
 0x29f   : > { %v998_v32 = vpop.f32.mrf.mxu1  ;;  %v1006_v35 = vpop.f32.mrf.mxu0 }
 0x2a0   : > { %v879_v36 = vmul.f32 -1.442695, %v627_v30  ;;  %v694_v37 = vmul.f32 %v1085_v27, %v688_v31 }
 0x2a1   : > { %v609_v39 = vpop.f32.mrf.mxu1  ;;  %v690_v40 = vpop.f32.mrf.mxu0 }
 0x2a2   : > { %1088 = vpow2.f32 %v879_v36  ;;  %v628_v41 = vadd.f32 %v609_v39, %v506_v33  ;;  %v696_v42 = vadd.f32 %v694_v37, %v508_v34  ;;  %v691_v43 = vadd.f32 %v1340_v48, %v690_v40 }
 0x2a3   : > { %v999_v52 = vpop.f32.mrf.mxu1  ;;  %v1007_v54 = vpop.f32.mrf.mxu0 }
 0x2a4   : > { %v880_v56 = vmul.f32 -1.442695, %v628_v41  ;;  %v695_v57 = vmul.f32 %v1087_v38, %v691_v43 }
 0x2a6   : > { %1090 = vpow2.f32 %v880_v56  ;;  %v697_v58 = vadd.f32 %v695_v57, %v509_v53 }
 0x2a7   : > { %1092 = vtanh.f32 %v696_v42 }
 0x2af   : > { %v1089_v59 = vpop.eup %1088 }
 0x2b0   : > { %v635_v60 = vadd.f32 1.0, %v1089_v59 }
 0x2b2   : > { %1094 = vrcp.f32 %v635_v60 }
 0x2b3   : > { %v1091_v61 = vpop.eup %1090 }
 0x2b4   : > { %v636_v62 = vadd.f32 1.0, %v1091_v61  ;;  %v1093_v51 = vpop.eup %1092 }
 0x2b6   : > { %1096 = vrcp.f32 %v636_v62 }
 0x2b7   : > { %1098 = vtanh.f32 %v697_v58 }
 0x2bf   : > { %v1095_v55 = vpop.eup %1094 }
 0x2c0   : > { %v700_v2 = vsub.f32 1.0, %v1095_v55  ;;  %v704_v4 = vmul.f32 %v1150_v0, %v1095_v55 }
 0x2c2   : > { %v702_v3 = vmul.f32 %v1093_v51, %v700_v2 }
 0x2c3   : > { %v1097_v5 = vpop.eup %1096 }
 0x2c4   : > { %v706_v6 = vadd.f32 %v704_v4, %v702_v3  ;;  %v701_v8 = vsub.f32 1.0, %v1097_v5  ;;  %v1099_v9 = vpop.eup %1098  ;;  %v705_v12 = vmul.f32 %v1146_v63, %v1097_v5 }
 0x2c6   : > { %v721_v10 = vsel %vm719_vm5, %v706_v6, %v1150_v0   ;;  %v703_v11 = vmul.f32 %v1099_v9, %v701_v8 }
 0x2c7   : > { %v1511_v0 = vmov %v721_v10  ;;  %496 = sbr.rel (!%p493_p1) target bundleno = 353 (0x161), region = 66  ;;  %v1513_v51 = vmov (%p493_p1), %v721_v10 }
 0x2c8   : > { %v707_v13 = vadd.f32 %v705_v12, %v703_v11 }
 0x2ca   : > { %v722_v14 = vsel %vm720_vm6, %v707_v13, %v1146_v63  }
 0x2cb   : > { %v1510_v63 = vmov %v722_v14  ;;  %v1512_v62 = vmov (%p493_p1), %v722_v14 }
 0x2cc PF:  { %v1100_v0 = vld [vmem:[%s1507_s7 + $0x8] sm:$0xff]   ;;  %v1171_v15 = vmov 0.0   ;;  %v1101_v44 = vld [vmem:[%s1507_s7] sm:$0xff]   ;;  %vm1172_vm7 = vmmov 0   ;;  %v723_v45 = vpack.c.bf16 %v1158_v62, %v1162_v51  ;;  %vm801_vm8 = vcmask 125952   ;;  %s1173_s7 = smov [#allocation6]   ;;  %v1162_v51 = vphi %v1425_v51, %v1513_v51   ;;  %v1158_v62 = vphi %v1423_v62, %v1512_v62  }
 0x2cd   :  { %1008 = vmatprep.subr.bf16.mxu0 %v1171_v15  ;;  %1012 = vmatprep.mubr.msk.bf16.mxu0 %vm1172_vm7, %v1171_v15  ;;  %v883_v46 = vld [vmem:[%s1508_s8] ss:$0 sm:$0xff]  ;;  %s809_s11 = sshll.u32 %s1173_s7, 4  ;;  %s810_s11 = int_to_ptr.vmem [resolvable:$true] %s809_s11 }
 0x2ce   :  { %1009 = vmatpush3.bf16.msra.mxu0 %v1100_v0  ;;  %s1102_s12 = scalar_lea.vmem %s810_s11, 128  ;;  %p1107_p3 = scmp.lt.s32.totalorder %s810_s11, %s810_s11 }
 0x2cf   :  { %1010 = vmatprep.subr.bf16.mxu0 %v1171_v15  ;;  %p1103_p2 = scmp.ne.s32.totalorder %s810_s11, %s1102_s12  ;;  %p1108_p4 = scmp.lt.s32.totalorder %s1102_s12, %s1102_s12 }
 0x2d1   :  { %p1109_p5 = por %p1108_p4, %p1107_p3 }
 0x2d2   :  { %1011 = vmatpush3.bf16.msra.mxu0 %v1101_v44 }
 0x2d3   :  { %p1110_p6 = pnand %p1109_p5, %p1103_p2 }
 0x2d5   :  { %1013 = vmatmul.mubr.msk.bf16.vlgmr.msra.gmra.mxu0 %vm228_vm1, %v723_v45 }
 0x395   :  { %v784_v47 = vpop.f32.mrf.mxu0 }
 0x396   :  { %v785_v48 = vadd.f32 %v883_v46, %v784_v47 }
 0x397   :  { %v1014_v49 = vpop.f32.mrf.mxu0 }
 0x398   :  { %v791_v50 = vmax.f32 %v785_v48, 0.0 }
 0x399   :  { %v787_v63 = vpop.f32.mrf.mxu0 }
 0x39a   :  { %v889_v16 = vpack.c.bf16 %v791_v50, %v791_v50  ;;  %v788_v17 = vadd.f32 %v883_v46, %v787_v63 }
 0x39b   :  { %v1015_v18 = vpop.f32.mrf.mxu0 }
 0x39c   :  { %v792_v19 = vmax.f32 %v788_v17, 0.0  ;;  %802 = vst.msk [vmem:[#allocation6] sm:$0xf] %vm801_vm8, %v889_v16 }
 0x39e   :  { %v890_v20 = vpack.c.bf16 %v792_v19, %v792_v19 }
 0x3a0   :  { %803 = vst.msk [vmem:[#allocation6 + $0x4] sm:$0xf] %vm801_vm8, %v890_v20 }
 0x3a1   :  { %1113 = shalt.err (!%p1110_p6)
}
 0x3a2   :  { %s1174_s8 = smov 4  }
 0x3a3   :  { %815 = dma.vmem_to_hbm [thread:$0]  %s810_s11, 128, %s1509_s9, [#allocation7], %s1165_s19, %s1165_s19, %s1174_s8  }
 0x3a4   :  { %1142 = dma.done.wait [#allocation7], 128  }
 0x3a5   :  { %1143 = vsyncadd [#allocation7], 4294967168 }
 0x3a6   :  { %819 = vsyncpa [#allocation7], 1 }

</bundles_post_ra>
